<compile_context>
chip_gen: v7x
topology: tpu7x:2x2x1
jax: 0.10.0
libtpu: 0.0.40
codegen_flags: <defaults>
</compile_context>

<pallas_src>
import jax
import jax.numpy as jnp
from jax.experimental import pallas as pl
from jax.experimental.pallas import tpu as pltpu


def _round_up(n, m):
    return ((n + m - 1) // m) * m


def _mlp_kernel(x_ref, w1_ref, b1_ref, w2_ref, b2_ref, w3d_ref, b3d_ref, o_ref):
    x = x_ref[...]  # already bf16 — streamed batch tile

    # Layer 1: Linear(D, 256) + ReLU  (bf16 x bf16 -> f32 accumulate on MXU)
    h1 = jnp.dot(x, w1_ref[...], preferred_element_type=jnp.float32) + b1_ref[...]
    h1 = jnp.maximum(h1, 0.0)
    # TODO(synk): Dropout(0.3) is identity in eval mode; a training-mode path
    # would use in-kernel pltpu.prng_seed + pltpu.prng_random_bits (no HBM mask).

    # Layer 2: Linear(256, 128) + ReLU
    h2 = jnp.dot(h1.astype(jnp.bfloat16), w2_ref[...],
                 preferred_element_type=jnp.float32) + b2_ref[...]
    h2 = jnp.maximum(h2, 0.0)
    # TODO(synk): Dropout(0.2) — identity in eval mode.

    # Layer 3 + Softmax(dim=1) over 2 classes, folded into a sigmoid of the
    # logit difference d = l1 - l0 (w3d/b3d are precomputed difference terms).
    d = jnp.dot(h2.astype(jnp.bfloat16), w3d_ref[...],
                preferred_element_type=jnp.float32) + b3d_ref[...]          # (tb, 1)
    # p1 = sigmoid(d); exp on the EUP, reciprocal also EUP (exact, still free).
    o_ref[...] = pl.reciprocal(1.0 + jnp.exp(-d), approx=False).astype(o_ref.dtype)


def _pick_batch_tile(B, D, *, cap=2048, x_vmem_budget=16 << 20):
    """Batch tile as a function of D: large enough to amortize the ~0.35us/step
    overhead, small enough that the double-buffered bf16 x tile fits the budget,
    with padding waste bounded to ~12.5%."""
    b8 = _round_up(max(B, 1), 8)
    tb = max(8, min(cap, (x_vmem_budget // (2 * D * 2)) // 8 * 8))
    tb = min(tb, b8)
    while tb > 8 and (_round_up(b8, tb) - b8) * 8 > b8:   # waste > 12.5% -> shrink
        tb = max(8, ((tb // 2) + 7) // 8 * 8)
    return tb, _round_up(b8, tb)


def news_classifier_forward(x, params):
    """x: (B, D) float32 or bfloat16. params: w1,b1,w2,b2,w3,b3, weights (in, out)."""
    B, D = x.shape
    w1, b1 = params["w1"], params["b1"]
    w2, b2 = params["w2"], params["b2"]
    w3, b3 = params["w3"], params["b3"]

    # bf16 weights feed the MXU; biases stay f32.
    w1b = w1.astype(jnp.bfloat16)
    w2b = w2.astype(jnp.bfloat16)
    # Fold the 2-class readout into a single difference column:
    #   softmax([l0, l1]) == [1 - sigmoid(l1 - l0), sigmoid(l1 - l0)]
    w3d = (w3[:, 1:2] - w3[:, 0:1]).astype(jnp.bfloat16)   # (128, 1)
    b3d = (b3[:, 1:2] - b3[:, 0:1]).astype(jnp.float32)    # (1, 1)

    # bf16 x stream (cast fuses into the producer via allow_input_fusion; ideally
    # the caller already supplies bf16 and this is a no-op).
    if x.dtype != jnp.bfloat16:
        x = x.astype(jnp.bfloat16)

    tb, bp = _pick_batch_tile(B, D)
    if bp != B:
        x = jnp.pad(x, ((0, bp - B), (0, 0)))

    # Single-buffer the grid-invariant (resident) weights/biases.
    def _resident(shape):
        nd = len(shape)
        return pl.BlockSpec(shape, lambda *_: (0,) * nd,
                            pipeline_mode=pl.Buffered(1))

    # Explicit VMEM budget: x double buffer + out double buffer + resident weights.
    vmem_need = (2 * tb * D * 2                      # x tiles (bf16, x2 buffers)
                 + 2 * tb * 128 * 4                  # out tiles (lane-padded f32)
                 + D * 256 * 2 + 256 * 128 * 2 + 128 * 128 * 2   # w1, w2, w3d (x1)
                 + 3 * 8 * 256 * 4)                  # biases (sublane-padded)
    vmem_limit = int(min(60 << 20, max(32 << 20, int(vmem_need * 1.5) + (4 << 20))))

    cost = pl.CostEstimate(
        flops=2 * bp * (D * 256 + 256 * 128 + 128),
        transcendentals=bp,
        bytes_accessed=bp * D * 2 + D * 256 * 2 + 256 * 128 * 2 + 128 * 2
                       + (256 + 128 + 1) * 4 + bp * 4,
    )

    p1 = pl.pallas_call(
        _mlp_kernel,
        out_shape=jax.ShapeDtypeStruct((bp, 1), jnp.float32),
        grid_spec=pltpu.PrefetchScalarGridSpec(
            num_scalar_prefetch=0,
            grid=(bp // tb,),
            in_specs=[
                pl.BlockSpec((tb, D), lambda i: (i, 0)),   # streamed batch tiles
                _resident(w1b.shape),
                _resident(b1.shape),
                _resident(w2b.shape),
                _resident(b2.shape),
                _resident(w3d.shape),
                _resident(b3d.shape),
            ],
            out_specs=pl.BlockSpec((tb, 1), lambda i: (i, 0)),
        ),
        compiler_params=pltpu.CompilerParams(
            dimension_semantics=("parallel",),   # v7x: shard batch tiles across 2 TCs
            vmem_limit_bytes=vmem_limit,
            allow_input_fusion=[True, False, False, False, False, False, False],
        ),
        cost_estimate=cost,
    )(x, w1b, b1, w2b, b2, w3d, b3d)

    p1 = p1[:B]
    # Assemble both softmax columns in the wrapper (tiny, rows sum to 1 exactly).
    return jnp.concatenate([1.0 - p1, p1], axis=1)


def init_params(key, input_dim):
    """PyTorch-like Linear init, but weights stored transposed as (in, out)."""
    dims = [(input_dim, 256), (256, 128), (128, 2)]
    params = {}
    for i, (fan_in, fan_out) in enumerate(dims, start=1):
        key, kw, kb = jax.random.split(key, 3)
        bound = 1.0 / jnp.sqrt(jnp.float32(fan_in))
        params[f"w{i}"] = jax.random.uniform(
            kw, (fan_in, fan_out), jnp.float32, minval=-bound, maxval=bound
        )
        params[f"b{i}"] = jax.random.uniform(
            kb, (1, fan_out), jnp.float32, minval=-bound, maxval=bound
        )
    return params


def _reference_forward(x, params):
    """Pure-JAX f32 reference (eval mode) for a correctness check."""
    h1 = jnp.maximum(x @ params["w1"] + params["b1"], 0.0)
    h2 = jnp.maximum(h1 @ params["w2"] + params["b2"], 0.0)
    logits = h2 @ params["w3"] + params["b3"]
    return jax.nn.softmax(logits, axis=1)


if __name__ == "__main__":
    key = jax.random.PRNGKey(0)
    k_x, k_p = jax.random.split(key)

    batch = 8
    input_dim = 32

    x = jax.random.normal(k_x, (batch, input_dim), jnp.float32)
    params = init_params(k_p, input_dim)

    probs = news_classifier_forward(x, params)
    probs = jax.block_until_ready(probs)

    assert probs.shape == (batch, 2)
    # Rows sum to 1 exactly by construction (p0 = 1 - p1).
    assert jnp.allclose(jnp.sum(probs, axis=1), 1.0, atol=1e-5)
    # Match the f32 reference within bf16 tolerance.
    ref = _reference_forward(x, params)
    assert jnp.allclose(probs, ref, atol=2e-2)

    print("KERNEL_OK")
</pallas_src>

<mosaic_0001>
module attributes {stable_mosaic.version = 11 : i64} {
  func.func @_mlp_kernel(%arg0: i32, %arg1: memref<8x32xbf16, #tpu.memory_space<vmem>>, %arg2: memref<32x256xbf16, #tpu.memory_space<vmem>>, %arg3: memref<1x256xf32, #tpu.memory_space<vmem>>, %arg4: memref<256x128xbf16, #tpu.memory_space<vmem>>, %arg5: memref<1x128xf32, #tpu.memory_space<vmem>>, %arg6: memref<128x1xbf16, #tpu.memory_space<vmem>>, %arg7: memref<1x1xf32, #tpu.memory_space<vmem>>, %arg8: memref<8x1xf32, #tpu.memory_space<vmem>>) attributes {dimension_semantics = [#tpu.dimension_semantics<parallel>], iteration_bounds = array<i64: 1>, scalar_prefetch = 0 : i64, scratch_operands = 0 : i64, tpu.core_type = #tpu.core_type<tc>, window_params = [{transform_indices = @transform_0, window_bounds = array<i64: 8, 32>}, {pipeline_mode = #tpu.pipeline_mode<synchronous>, transform_indices = @transform_1, window_bounds = array<i64: 32, 256>}, {pipeline_mode = #tpu.pipeline_mode<synchronous>, transform_indices = @transform_2, window_bounds = array<i64: 1, 256>}, {pipeline_mode = #tpu.pipeline_mode<synchronous>, transform_indices = @transform_3, window_bounds = array<i64: 256, 128>}, {pipeline_mode = #tpu.pipeline_mode<synchronous>, transform_indices = @transform_4, window_bounds = array<i64: 1, 128>}, {pipeline_mode = #tpu.pipeline_mode<synchronous>, transform_indices = @transform_5, window_bounds = array<i64: 128, 1>}, {pipeline_mode = #tpu.pipeline_mode<synchronous>, transform_indices = @transform_6, window_bounds = array<i64: 1, 1>}, {transform_indices = @transform_7, window_bounds = array<i64: 8, 1>}]} {
    %c0 = arith.constant 0 : index
    %c0_0 = arith.constant 0 : index
    %0 = vector.load %arg1[%c0, %c0_0] : memref<8x32xbf16, #tpu.memory_space<vmem>>, vector<8x32xbf16>
    %c0_1 = arith.constant 0 : index
    %c0_2 = arith.constant 0 : index
    %1 = vector.load %arg2[%c0_1, %c0_2] : memref<32x256xbf16, #tpu.memory_space<vmem>>, vector<32x256xbf16>
    %cst = arith.constant dense<0.000000e+00> : vector<8x256xf32>
    %2 = tpu.matmul %0, %1, %cst {dimension_numbers = #tpu.dot_dimension_numbers<[1], [0], [0], [1], [0, 0, 1, 1], [], []>} : vector<8x32xbf16>, vector<32x256xbf16>, vector<8x256xf32> -> vector<8x256xf32>
    %c0_3 = arith.constant 0 : index
    %c0_4 = arith.constant 0 : index
    %3 = vector.load %arg3[%c0_3, %c0_4] : memref<1x256xf32, #tpu.memory_space<vmem>>, vector<1x256xf32>
    %4 = vector.broadcast %3 : vector<1x256xf32> to vector<8x256xf32>
    %5 = arith.addf %2, %4 : vector<8x256xf32>
    %cst_5 = arith.constant 0.000000e+00 : f32
    %6 = vector.broadcast %cst_5 : f32 to vector<8x256xf32>
    %7 = arith.maximumf %5, %6 : vector<8x256xf32>
    %8 = arith.truncf %7 : vector<8x256xf32> to vector<8x256xbf16>
    %c0_6 = arith.constant 0 : index
    %c0_7 = arith.constant 0 : index
    %9 = vector.load %arg4[%c0_6, %c0_7] : memref<256x128xbf16, #tpu.memory_space<vmem>>, vector<256x128xbf16>
    %cst_8 = arith.constant dense<0.000000e+00> : vector<8x128xf32>
    %10 = tpu.matmul %8, %9, %cst_8 {dimension_numbers = #tpu.dot_dimension_numbers<[1], [0], [0], [1], [0, 0, 1, 1], [], []>} : vector<8x256xbf16>, vector<256x128xbf16>, vector<8x128xf32> -> vector<8x128xf32>
    %c0_9 = arith.constant 0 : index
    %c0_10 = arith.constant 0 : index
    %11 = vector.load %arg5[%c0_9, %c0_10] : memref<1x128xf32, #tpu.memory_space<vmem>>, vector<1x128xf32>
    %12 = vector.broadcast %11 : vector<1x128xf32> to vector<8x128xf32>
    %13 = arith.addf %10, %12 : vector<8x128xf32>
    %cst_11 = arith.constant 0.000000e+00 : f32
    %14 = vector.broadcast %cst_11 : f32 to vector<8x128xf32>
    %15 = arith.maximumf %13, %14 : vector<8x128xf32>
    %16 = arith.truncf %15 : vector<8x128xf32> to vector<8x128xbf16>
    %c0_12 = arith.constant 0 : index
    %c0_13 = arith.constant 0 : index
    %17 = vector.load %arg6[%c0_12, %c0_13] : memref<128x1xbf16, #tpu.memory_space<vmem>>, vector<128x1xbf16>
    %cst_14 = arith.constant dense<0.000000e+00> : vector<8x1xf32>
    %18 = tpu.matmul %16, %17, %cst_14 {dimension_numbers = #tpu.dot_dimension_numbers<[1], [0], [0], [1], [0, 0, 1, 1], [], []>} : vector<8x128xbf16>, vector<128x1xbf16>, vector<8x1xf32> -> vector<8x1xf32>
    %c0_15 = arith.constant 0 : index
    %c0_16 = arith.constant 0 : index
    %19 = vector.load %arg7[%c0_15, %c0_16] : memref<1x1xf32, #tpu.memory_space<vmem>>, vector<1x1xf32>
    %20 = vector.broadcast %19 : vector<1x1xf32> to vector<8x1xf32>
    %21 = arith.addf %18, %20 : vector<8x1xf32>
    %cst_17 = arith.constant 0.000000e+00 : f32
    %22 = vector.broadcast %cst_17 : f32 to vector<8x1xf32>
    %23 = arith.subf %22, %21 : vector<8x1xf32>
    %24 = math.exp %23 : vector<8x1xf32>
    %cst_18 = arith.constant 1.000000e+00 : f32
    %25 = vector.broadcast %cst_18 : f32 to vector<8x1xf32>
    %26 = arith.addf %25, %24 : vector<8x1xf32>
    %27 = tpu.reciprocal %26 : vector<8x1xf32> -> vector<8x1xf32>
    %c0_19 = arith.constant 0 : index
    %c0_20 = arith.constant 0 : index
    %28 = vector.load %arg8[%c0_19, %c0_20] : memref<8x1xf32, #tpu.memory_space<vmem>>, vector<8x1xf32>
    tpu.vector_store %arg8[%c0_19, %c0_20], %27 {strides = array<i32>} : memref<8x1xf32, #tpu.memory_space<vmem>>, vector<8x1xf32>,
    return
  }
  func.func @transform_0(%arg0: i32) -> (i32, i32) {
    %c0_i32 = arith.constant 0 : i32
    %c0_i32_0 = arith.constant 0 : i32
    return %arg0, %c0_i32 : i32, i32
  }
  func.func @transform_1(%arg0: i32) -> (i32, i32) {
    %c0_i32 = arith.constant 0 : i32
    %c0_i32_0 = arith.constant 0 : i32
    %c0_i32_1 = arith.constant 0 : i32
    return %c0_i32, %c0_i32_0 : i32, i32
  }
  func.func @transform_2(%arg0: i32) -> (i32, i32) {
    %c0_i32 = arith.constant 0 : i32
    %c0_i32_0 = arith.constant 0 : i32
    %c0_i32_1 = arith.constant 0 : i32
    return %c0_i32, %c0_i32_0 : i32, i32
  }
  func.func @transform_3(%arg0: i32) -> (i32, i32) {
    %c0_i32 = arith.constant 0 : i32
    %c0_i32_0 = arith.constant 0 : i32
    %c0_i32_1 = arith.constant 0 : i32
    return %c0_i32, %c0_i32_0 : i32, i32
  }
  func.func @transform_4(%arg0: i32) -> (i32, i32) {
    %c0_i32 = arith.constant 0 : i32
    %c0_i32_0 = arith.constant 0 : i32
    %c0_i32_1 = arith.constant 0 : i32
    return %c0_i32, %c0_i32_0 : i32, i32
  }
  func.func @transform_5(%arg0: i32) -> (i32, i32) {
    %c0_i32 = arith.constant 0 : i32
    %c0_i32_0 = arith.constant 0 : i32
    %c0_i32_1 = arith.constant 0 : i32
    return %c0_i32, %c0_i32_0 : i32, i32
  }
  func.func @transform_6(%arg0: i32) -> (i32, i32) {
    %c0_i32 = arith.constant 0 : i32
    %c0_i32_0 = arith.constant 0 : i32
    %c0_i32_1 = arith.constant 0 : i32
    return %c0_i32, %c0_i32_0 : i32, i32
  }
  func.func @transform_7(%arg0: i32) -> (i32, i32) {
    %c0_i32 = arith.constant 0 : i32
    %c0_i32_0 = arith.constant 0 : i32
    return %arg0, %c0_i32 : i32, i32
  }
}

</mosaic_0001>

<bundles_post_ra>
// kernel: tpu_custom_call.1
= control target key start
LH: loop header
LB: loop body
LE: loop exit
PB: predicated region body
PF: predicated region fallthrough
CT: control target
= control target key end

     0   :  { %s684_s0 = inlined_call_operand.vmem [shape: bf16[8,32], index: 0, kind: input, shape index: {}]   ;;  %s685_s1 = inlined_call_operand.vmem [shape: bf16[32,256], index: 1, kind: input, shape index: {}]   ;;  %s686_s2 = inlined_call_operand.vmem [shape: f32[1,256], index: 2, kind: input, shape index: {}]   ;;  %s687_s3 = inlined_call_operand.hbm [shape: bf16[256,128], index: 3, kind: input, shape index: {}]   ;;  %s688_s4 = inlined_call_operand.vmem [shape: f32[1,128], index: 4, kind: input, shape index: {}]   ;;  %s689_s5 = inlined_call_operand.vmem [shape: bf16[128,1], index: 5, kind: input, shape index: {}]   ;;  %s690_s6 = inlined_call_operand.<no memory space> [shape: f32[1,1], index: 6, kind: input, shape index: {}]   ;;  %s691_s7 = inlined_call_operand.vmem [shape: f32[8,1], index: 7, kind: output, shape index: {}]  }
   0x1   :  { %v12_v0 = vstv %s690_s6 }
   0x2   :  { %13 = vst [vmem:[#allocation2] sm:$0x1] %v12_v0 }
   0x3   :  { %14 = vsyncpa [#allocation4], 0  ;;  %s575_s26 = smov [#allocation3]   ;;  %s551_s30 = scalar_lea.hbm %s687_s3, 2048 }
   0x4   :  { %s26_s27 = sshll.u32 %s575_s26, 4  ;;  %p552_p0 = scmp.ne.s32.totalorder %s687_s3, %s551_s30  ;;  %s27_s27 = int_to_ptr.vmem [resolvable:$true] %s26_s27 }
   0x5   :  { %p555_p1 = scmp.lt.u32.totalorder %s551_s30, %s687_s3 }
   0x7   :  { %p557_p2 = pnand %p555_p1, %p552_p0 }
   0x9   :  { %560 = shalt.err (!%p557_p2)
}
   0xa   :  { %s561_s6 = scalar_lea.vmem %s27_s27, 2048  ;;  %p566_p4 = scmp.lt.s32.totalorder %s27_s27, %s27_s27 }
   0xb   :  { %p562_p3 = scmp.ne.s32.totalorder %s27_s27, %s561_s6  ;;  %p567_p5 = scmp.lt.s32.totalorder %s561_s6, %s561_s6 }
   0xd   :  { %p568_p6 = por %p567_p5, %p566_p4 }
   0xf   :  { %p569_p7 = pnand %p568_p6, %p562_p3 }
  0x11   :  { %572 = shalt.err (!%p569_p7)
}
  0x12   :  { %s576_s12 = smov 64   ;;  %s577_s13 = smov 4  }
  0x13   :  { %32 = dma.hbm_to_vmem [thread:$0]  %s687_s3, 2048, %s27_s27, [#allocation4], %s576_s12, %s576_s12, %s577_s13  }
  0x14   :  { %573 = dma.done.wait [#allocation4], 2048  }
  0x15   :  { %574 = vsyncadd [#allocation4], 4294965248  ;;  %v578_v1 = vmov 0   ;;  %v517_v2 = vld [vmem:[%s685_s1 + $0x4] ss:$8 sps:$4 sm:$0xff]   ;;  %vm80_vm0 = vcmask 261120   ;;  %v50_v30 = vlaneseq }
  0x16   :  { %116 = vmatprep.mubr.bf16.mxu0 %v578_v1  ;;  %v519_v3 = vld [vmem:[%s685_s1] ss:$8 sps:$4 sm:$0xff]   ;;  %84 = vmatprep.subr.bf16.mxu0 %v517_v2  ;;  %v520_v4 = vld [vmem:[%s685_s1 + $0x14] ss:$8 sps:$4 sm:$0xff]   ;;  %v522_v5 = vld [vmem:[%s685_s1 + $0x10] ss:$8 sps:$4 sm:$0xff]  }
  0x17   :  { %85 = vmatpush1.bf16.msra.mxu0 %v519_v3  ;;  %v523_v6 = vld [vmem:[#allocation3 + $0x40] sm:$0xff]   ;;  %v525_v9 = vld [vmem:[#allocation3 + $0x48] sm:$0xff]   ;;  %v527_v11 = vld [vmem:[#allocation3 + $0x50] sm:$0xff]   ;;  %v579_v24 = vmov 0.0   ;;  %v51_v31 = vshrl.u32 %v50_v30, 7  ;;  %vm580_vm1 = vmmov 0  }
  0x18   :  { %86 = vmatprep.subr.bf16.mxu0 %v520_v4  ;;  %v524_v7 = vld [vmem:[#allocation3] sm:$0xff]   ;;  %460 = vmatprep.subr.bf16.mxu1 %v523_v6  ;;  %v526_v10 = vld [vmem:[#allocation3 + $0x8] sm:$0xff]   ;;  %v528_v12 = vld [vmem:[#allocation3 + $0x10] sm:$0xff]   ;;  %vm422_vm2 = vcmask 7168  }
  0x19   :  { %v43_v8 = vld [vmem:[%s684_s0] sm:$0xf]  ;;  %461 = vmatpush3.bf16.msra.mxu1 %v524_v7  ;;  %v533_v17 = vld [vmem:[#allocation3 + $0x68] sm:$0xff]   ;;  %v535_v19 = vld [vmem:[#allocation3 + $0x70] sm:$0xff]   ;;  %v52_v32 = vsub.s32 0, %v51_v31  ;;  %v56_v34 = vsub.s32 1, %v51_v31 }
  0x1a   :  { %462 = vmatprep.subr.bf16.mxu1 %v525_v9  ;;  %v529_v13 = vld [vmem:[#allocation3 + $0x58] sm:$0xff]   ;;  %v531_v15 = vld [vmem:[#allocation3 + $0x60] sm:$0xff]   ;;  %v534_v18 = vld [vmem:[#allocation3 + $0x28] sm:$0xff]  }
  0x1b   :  { %87 = vmatpush1.bf16.msra.mxu0 %v522_v5  ;;  %v530_v14 = vld [vmem:[#allocation3 + $0x18] sm:$0xff]   ;;  %v532_v16 = vld [vmem:[#allocation3 + $0x20] sm:$0xff]   ;;  %v536_v20 = vld [vmem:[#allocation3 + $0x30] sm:$0xff]  }
  0x1c   :  { %v537_v21 = vld [vmem:[#allocation3 + $0x78] sm:$0xff]   ;;  %491 = vmatprep.subr.bf16.mxu0 %v579_v24  ;;  %v540_v25 = vld [vmem:[%s689_s5 + $0x8] sm:$0xff]   ;;  %v541_v26 = vld [vmem:[%s689_s5 + $0x10] sm:$0xff]  }
  0x1d   :  { %463 = vmatpush3.bf16.msra.mxu1 %v526_v10  ;;  %v538_v22 = vld [vmem:[#allocation3 + $0x38] sm:$0xff]   ;;  %v544_v29 = vld [vmem:[%s689_s5 + $0x28] sm:$0xff]   ;;  %v545_v47 = vld [vmem:[%s689_s5 + $0x30] sm:$0xff]  }
  0x1e   :  { %433 = vmatmul.mubr.msk.bf16.vlgmr.msra.gmra.mrb[0].mxu0 %vm80_vm0, %v43_v8  ;;  %464 = vmatprep.subr.bf16.mxu1 %v527_v11  ;;  %v539_v23 = vld [vmem:[%s689_s5] sm:$0xff]   ;;  %v542_v27 = vld [vmem:[%s689_s5 + $0x18] sm:$0xff]  }
  0x1f   :  { %492 = vmatpush3.bf16.msra.mxu0 %v539_v23  ;;  %v543_v28 = vld [vmem:[%s689_s5 + $0x20] sm:$0xff]   ;;  %v546_v48 = vld [vmem:[%s689_s5 + $0x38] sm:$0xff]   ;;  %507 = vmatprep.mubr.msk.bf16.mxu0 %vm580_vm1, %v579_v24 }
  0x20   :  { %493 = vmatprep.subr.bf16.mxu0 %v579_v24  ;;  %v48_v33 = vld [vmem:[%s686_s2] sm:$0x3] }
  0x21   :  { %465 = vmatpush3.bf16.msra.mxu1 %v528_v12  ;;  %v53_v35 = vrot.slane %v48_v33, %v52_v32  ;;  %v57_v36 = vrot.slane %v48_v33, %v56_v34  ;;  %v434_v50 = vld [vmem:[%s688_s4] ss:$0 sm:$0xff] }
  0x22   :  { %466 = vmatprep.subr.bf16.mxu1 %v529_v13  ;;  %v451_v58 = vld [vmem:[#allocation2] ss:$0 sm:$0xff] }
  0x23   :  { %494 = vmatpush3.bf16.msra.mxu0 %v540_v25 }
  0x24   :  { %495 = vmatprep.subr.bf16.mxu0 %v579_v24 }
  0x25   :  { %467 = vmatpush3.bf16.msra.mxu1 %v530_v14 }
  0x26   :  { %468 = vmatprep.subr.bf16.mxu1 %v531_v15 }
  0x27   :  { %496 = vmatpush3.bf16.msra.mxu0 %v541_v26 }
  0x28   :  { %497 = vmatprep.subr.bf16.mxu0 %v579_v24 }
  0x29   :  { %469 = vmatpush3.bf16.msra.mxu1 %v532_v16 }
  0x2a   :  { %470 = vmatprep.subr.bf16.mxu1 %v533_v17 }
  0x2b   :  { %498 = vmatpush3.bf16.msra.mxu0 %v542_v27 }
  0x2c   :  { %499 = vmatprep.subr.bf16.mxu0 %v579_v24 }
  0x2d   :  { %471 = vmatpush3.bf16.msra.mxu1 %v534_v18 }
  0x2e   :  { %472 = vmatprep.subr.bf16.mxu1 %v535_v19 }
  0x2f   :  { %500 = vmatpush3.bf16.msra.mxu0 %v543_v28 }
  0x30   :  { %501 = vmatprep.subr.bf16.mxu0 %v579_v24 }
  0x31   :  { %473 = vmatpush3.bf16.msra.mxu1 %v536_v20 }
  0x32   :  { %474 = vmatprep.subr.bf16.mxu1 %v537_v21 }
  0x33   :  { %502 = vmatpush3.bf16.msra.mxu0 %v544_v29 }
  0x34   :  { %503 = vmatprep.subr.bf16.mxu0 %v579_v24 }
  0x35   :  { %475 = vmatpush3.bf16.msra.mxu1 %v538_v22 }
  0x37   :  { %504 = vmatpush3.bf16.msra.mxu0 %v545_v47 }
  0x38   :  { %505 = vmatprep.subr.bf16.mxu0 %v579_v24 }
  0x3b   :  { %506 = vmatpush3.bf16.msra.mxu0 %v546_v48 }
  0xf1   :  { %v118_v37 = vpop.f32.mrb[0].mxu0 }
  0xf2   :  { %v119_v38 = vadd.f32 %v118_v37, %v53_v35  ;;  %v120_v39 = vpop.f32.mrb[1].mxu0 }
  0xf3   :  { %v121_v40 = vadd.f32 %v120_v39, %v57_v36  ;;  %v122_v41 = vpop.f32.mrb[2].mxu0 }
  0xf4   :  { %v125_v42 = vmax.f32 %v119_v38, 0.0  ;;  %v123_v43 = vpop.f32.mrb[3].mxu0 }
  0xf5   :  { %v126_v44 = vmax.f32 %v121_v40, 0.0 }
  0xf6   :  { %v127_v46 = vpack.c.bf16 %v125_v42, %v125_v42 }
  0xf7   :  { %v128_v45 = vpack.c.bf16 %v126_v44, %v126_v44 }
  0xf9   :  { %296 = vmatprep.mubr.bf16.mxu1 %v128_v45 }
  0xfa   :  { %297 = vmatmul.mubr.bf16.vlgmr.msra.gmra.mrb[0].mxu1 %v127_v46 }
 0x1cd   :  { %v476_v49 = vpop.f32.mrb[0].mxu1 }
 0x1ce   :  { %v477_v51 = vpop.f32.mrb[1].mxu1 }
 0x1cf   :  { %v478_v52 = vadd.f32 %v477_v51, %v476_v49  ;;  %v479_v53 = vpop.f32.mrb[2].mxu1 }
 0x1d0   :  { %v480_v54 = vpop.f32.mrb[3].mxu1 }
 0x1d1   :  { %v299_v55 = vadd.f32 %v478_v52, %v434_v50 }
 0x1d3   :  { %v304_v56 = vmax.f32 %v299_v55, 0.0 }
 0x1d5   :  { %v305_v57 = vpack.c.bf16 %v304_v56, %v304_v56 }
 0x1d7   :  { %508 = vmatmul.mubr.bf16.vlgmr.msra.gmra.mrb[4].mxu0 %v305_v57 }
 0x2aa   :  { %v411_v59 = vpop.f32.mrb[4].mxu0 }
 0x2ab   :  { %v412_v60 = vadd.f32 %v451_v58, %v411_v59  ;;  %v509_v61 = vpop.f32.mrb[5].mxu0 }
 0x2ac   :  { %v414_v62 = vpop.f32.mrb[6].mxu0 }
 0x2ad   :  { %v417_v63 = vsub.f32 0.0, %v412_v60  ;;  %v510_v0 = vpop.f32.mrb[7].mxu0 }
 0x2af   :  { %v418_v1 = vmul.f32 1.442695, %v417_v63 }
 0x2b1   :  { %547 = vpow2.f32 %v418_v1 }
 0x2bb   :  { %v548_v2 = vpop.eup %547 }
 0x2bc   :  { %v420_v3 = vadd.f32 1.0, %v548_v2 }
 0x2be   :  { %549 = vrcp.f32 %v420_v3 }
 0x2c8   :  { %v550_v4 = vpop.eup %549 }
 0x2c9   :  { %423 = vst.msk [vmem:[%s691_s7] sm:$0xff] %vm422_vm2, %v550_v4 }
 0x2ca   :  { %428 = vsyncpa [#allocation4], 1 }

</bundles_post_ra>
